<compile_context>
chip_gen: v5e
topology: v5e:2x2
jax: 0.10.0
libtpu: 0.0.40
codegen_flags: <defaults>
</compile_context>

<pallas_src>
import jax
import jax.numpy as jnp
from jax.experimental import pallas as pl
from jax.experimental.pallas import tpu as pltpu


# --------------------------------------------------------------------------- #
# Kernel
# --------------------------------------------------------------------------- #
def mlp_kernel(
    x_ref,
    w1_ref, b1_ref,
    w2_ref, b2_ref,
    w3_ref, b3_ref,
    w4_ref, b4_ref,
    w5t_ref, b5t_ref,
    o_ref,
):
    """Fused 5-layer MLP forward on one (TM, n_feature) batch tile.

    Weights are bf16 (MXU operands, BN already folded in), biases are f32.
    The output is written transposed as (n_output, TM) so the lane dimension
    is the dense batch tile.
    """

    def layer(h, w_ref, b_ref):
        # bf16 x bf16 -> f32 accumulation on the MXU; ReLU on the VPU in f32.
        z = jnp.dot(h.astype(w_ref.dtype), w_ref[...],
                    preferred_element_type=jnp.float32) + b_ref[...]
        return jnp.maximum(z, 0.0)

    h = x_ref[...]                       # f32 tile [TM, n_feature]; cast in layer()
    h = layer(h, w1_ref, b1_ref)
    h = layer(h, w2_ref, b2_ref)
    h = layer(h, w3_ref, b3_ref)
    h = layer(h, w4_ref, b4_ref)

    # Final Linear, computed directly in transposed form:
    #   out_t[n, m] = sum_k W5T[n, k] * h[m, k]   (contract last dims)
    out_t = jax.lax.dot_general(
        w5t_ref[...], h.astype(w5t_ref.dtype),
        dimension_numbers=(((1,), (1,)), ((), ())),
        preferred_element_type=jnp.float32,
    ) + b5t_ref[...]                      # (n_output, TM) + (n_output, 1)
    o_ref[...] = out_t.astype(o_ref.dtype)


# --------------------------------------------------------------------------- #
# Wrapper
# --------------------------------------------------------------------------- #
def mlp_forward(x, params, *, tm=256):
    """x: [batch, n_feature] f32. params: w1..w5 [in,out], b1..b5 [1,out],
    and g/be/m/v (gamma/beta/running_mean/running_var) [1,out] for bn1..bn4."""
    eps = 1e-5
    batch, n_feature = x.shape
    n_output = params["w5"].shape[1]

    # ---- fold eval-mode BN into the *next* layer (runs once under jit) ------
    # h_k = relu(...)*scale_k + shift_k, so the next Linear absorbs the affine:
    #   W'_{k+1} = diag(scale_k) @ W_{k+1},  b'_{k+1} = b_{k+1} + shift_k @ W_{k+1}
    ws = [params["w1"]]
    bs = [params["b1"]]
    for idx in range(1, 5):
        scale = params[f"g{idx}"] / jnp.sqrt(params[f"v{idx}"] + eps)   # (1, fk)
        shift = params[f"be{idx}"] - params[f"m{idx}"] * scale          # (1, fk)
        w_next = params[f"w{idx + 1}"]                                  # (fk, fk1)
        b_next = params[f"b{idx + 1}"]                                  # (1, fk1)
        ws.append(scale.T * w_next)
        bs.append(b_next + shift @ w_next)

    weights = [w.astype(jnp.bfloat16) for w in ws[:4]]
    biases = [b.astype(jnp.float32) for b in bs[:4]]
    w5t = ws[4].T.astype(jnp.bfloat16)        # (n_output, n_hidden // 8)
    b5t = bs[4].T.astype(jnp.float32)         # (n_output, 1)

    # ---- batch tiling --------------------------------------------------------
    # Output is stored transposed (n_output, batch): the batch tile is the lane
    # dimension, so multi-tile grids keep tm a multiple of 128.
    if batch <= 128:
        tm = max(8, -(-batch // 8) * 8)                    # single tile
    else:
        tm = max(128, (tm // 128) * 128)
        if pl.cdiv(batch, tm) < 2:
            # Keep >=2 "parallel" grid steps so v7x's two TensorCores share work.
            tm = -(-((batch + 1) // 2) // 128) * 128
    n_tiles = pl.cdiv(batch, tm)
    b_pad = n_tiles * tm
    x_p = jnp.pad(x, ((0, b_pad - batch), (0, 0)))         # f32; cast in-kernel

    # ---- specs ---------------------------------------------------------------
    # Streamed: x and out move with the grid index.
    x_spec = pl.BlockSpec((tm, n_feature), lambda i: (i, 0))
    out_spec = pl.BlockSpec((n_output, tm), lambda i: (0, i))   # lane-dense store

    # Resident: weights / biases use a constant index_map so they are loaded
    # once and stay in VMEM across all grid steps.
    def resident(a):
        return pl.BlockSpec(a.shape, lambda i: (0, 0))

    operands = (
        x_p,
        weights[0], biases[0],
        weights[1], biases[1],
        weights[2], biases[2],
        weights[3], biases[3],
        w5t, b5t,
    )
    in_specs = [x_spec] + [resident(a) for a in operands[1:]]

    out_t = pl.pallas_call(
        mlp_kernel,
        out_shape=jax.ShapeDtypeStruct((n_output, b_pad), jnp.float32),
        grid=(n_tiles,),
        in_specs=in_specs,
        out_specs=out_spec,
        compiler_params=pltpu.CompilerParams(
            dimension_semantics=("parallel",),
        ),
    )(*operands)

    # Back to (batch, n_output); a (n_output, batch) transpose is trivial.
    return out_t[:, :batch].T


# --------------------------------------------------------------------------- #
# Parameters / reference
# --------------------------------------------------------------------------- #
def make_params(key, n_feature, n_hidden, n_output):
    dims = [
        (n_feature, n_hidden),
        (n_hidden, n_hidden // 2),
        (n_hidden // 2, n_hidden // 4),
        (n_hidden // 4, n_hidden // 8),
        (n_hidden // 8, n_output),
    ]
    params = {}
    keys = jax.random.split(key, 32)
    ki = 0
    for idx, (fin, fout) in enumerate(dims, start=1):
        bound = 1.0 / jnp.sqrt(fin)
        params[f"w{idx}"] = jax.random.uniform(
            keys[ki], (fin, fout), jnp.float32, -bound, bound); ki += 1
        params[f"b{idx}"] = jax.random.uniform(
            keys[ki], (1, fout), jnp.float32, -bound, bound); ki += 1
        if idx <= 4:  # BN after the first four hidden layers
            params[f"g{idx}"] = jnp.ones((1, fout), jnp.float32)
            params[f"be{idx}"] = jnp.zeros((1, fout), jnp.float32)
            params[f"m{idx}"] = 0.1 * jax.random.normal(
                keys[ki], (1, fout), jnp.float32); ki += 1
            params[f"v{idx}"] = 1.0 + 0.1 * jax.random.uniform(
                keys[ki], (1, fout), jnp.float32); ki += 1
    return params


def reference_forward(x, params):
    """Plain-JAX eval-mode reference (unfused BN) with bf16 matmul operands and
    f32 accumulation, mirroring the kernel's precision."""
    eps = 1e-5
    h = x
    for idx in range(1, 5):
        w = params[f"w{idx}"].astype(jnp.bfloat16)
        z = jnp.dot(h.astype(jnp.bfloat16), w,
                    preferred_element_type=jnp.float32) + params[f"b{idx}"]
        z = jnp.maximum(z, 0.0)
        scale = params[f"g{idx}"] / jnp.sqrt(params[f"v{idx}"] + eps)
        h = (z - params[f"m{idx}"]) * scale + params[f"be{idx}"]
    return jnp.dot(h.astype(jnp.bfloat16), params["w5"].astype(jnp.bfloat16),
                   preferred_element_type=jnp.float32) + params["b5"]


if __name__ == "__main__":
    n_feature, n_hidden, n_output, batch = 16, 32, 4, 256

    key = jax.random.PRNGKey(0)
    kx, kp = jax.random.split(key)
    x = jax.random.normal(kx, (batch, n_feature), jnp.float32)
    params = make_params(kp, n_feature, n_hidden, n_output)

    out = mlp_forward(x, params)
    out = jax.block_until_ready(out)

    ref = reference_forward(x, params)
    assert out.shape == (batch, n_output)
    assert jnp.allclose(out, ref, atol=2e-2, rtol=2e-2), "mismatch vs reference"

    print("KERNEL_OK")
</pallas_src>

<mosaic_0001>
module attributes {stable_mosaic.version = 11 : i64} {
  func.func @mlp_kernel(%arg0: i32, %arg1: memref<128x16xf32, #tpu.memory_space<vmem>>, %arg2: memref<16x32xbf16, #tpu.memory_space<vmem>>, %arg3: memref<1x32xf32, #tpu.memory_space<vmem>>, %arg4: memref<32x16xbf16, #tpu.memory_space<vmem>>, %arg5: memref<1x16xf32, #tpu.memory_space<vmem>>, %arg6: memref<16x8xbf16, #tpu.memory_space<vmem>>, %arg7: memref<1x8xf32, #tpu.memory_space<vmem>>, %arg8: memref<8x4xbf16, #tpu.memory_space<vmem>>, %arg9: memref<1x4xf32, #tpu.memory_space<vmem>>, %arg10: memref<4x4xbf16, #tpu.memory_space<vmem>>, %arg11: memref<4x1xf32, #tpu.memory_space<vmem>>, %arg12: memref<4x128xf32, #tpu.memory_space<vmem>>) attributes {dimension_semantics = [#tpu.dimension_semantics<parallel>], iteration_bounds = array<i64: 2>, scalar_prefetch = 0 : i64, scratch_operands = 0 : i64, tpu.core_type = #tpu.core_type<tc>, window_params = [{transform_indices = @transform_0, window_bounds = array<i64: 128, 16>}, {pipeline_mode = #tpu.pipeline_mode<synchronous>, transform_indices = @transform_1, window_bounds = array<i64: 16, 32>}, {pipeline_mode = #tpu.pipeline_mode<synchronous>, transform_indices = @transform_2, window_bounds = array<i64: 1, 32>}, {pipeline_mode = #tpu.pipeline_mode<synchronous>, transform_indices = @transform_3, window_bounds = array<i64: 32, 16>}, {pipeline_mode = #tpu.pipeline_mode<synchronous>, transform_indices = @transform_4, window_bounds = array<i64: 1, 16>}, {pipeline_mode = #tpu.pipeline_mode<synchronous>, transform_indices = @transform_5, window_bounds = array<i64: 16, 8>}, {pipeline_mode = #tpu.pipeline_mode<synchronous>, transform_indices = @transform_6, window_bounds = array<i64: 1, 8>}, {pipeline_mode = #tpu.pipeline_mode<synchronous>, transform_indices = @transform_7, window_bounds = array<i64: 8, 4>}, {pipeline_mode = #tpu.pipeline_mode<synchronous>, transform_indices = @transform_8, window_bounds = array<i64: 1, 4>}, {pipeline_mode = #tpu.pipeline_mode<synchronous>, transform_indices = @transform_9, window_bounds = array<i64: 4, 4>}, {pipeline_mode = #tpu.pipeline_mode<synchronous>, transform_indices = @transform_10, window_bounds = array<i64: 4, 1>}, {transform_indices = @transform_11, window_bounds = array<i64: 4, 128>}]} {
    %c0 = arith.constant 0 : index
    %c0_0 = arith.constant 0 : index
    %0 = vector.load %arg1[%c0, %c0_0] : memref<128x16xf32, #tpu.memory_space<vmem>>, vector<128x16xf32>
    %1 = arith.truncf %0 : vector<128x16xf32> to vector<128x16xbf16>
    %c0_1 = arith.constant 0 : index
    %c0_2 = arith.constant 0 : index
    %2 = vector.load %arg2[%c0_1, %c0_2] : memref<16x32xbf16, #tpu.memory_space<vmem>>, vector<16x32xbf16>
    %cst = arith.constant dense<0.000000e+00> : vector<128x32xf32>
    %3 = tpu.matmul %1, %2, %cst {dimension_numbers = #tpu.dot_dimension_numbers<[1], [0], [0], [1], [0, 0, 1, 1], [], []>} : vector<128x16xbf16>, vector<16x32xbf16>, vector<128x32xf32> -> vector<128x32xf32>
    %c0_3 = arith.constant 0 : index
    %c0_4 = arith.constant 0 : index
    %4 = vector.load %arg3[%c0_3, %c0_4] : memref<1x32xf32, #tpu.memory_space<vmem>>, vector<1x32xf32>
    %5 = vector.broadcast %4 : vector<1x32xf32> to vector<128x32xf32>
    %6 = arith.addf %3, %5 : vector<128x32xf32>
    %cst_5 = arith.constant 0.000000e+00 : f32
    %7 = vector.broadcast %cst_5 : f32 to vector<128x32xf32>
    %8 = arith.maximumf %6, %7 : vector<128x32xf32>
    %9 = arith.truncf %8 : vector<128x32xf32> to vector<128x32xbf16>
    %c0_6 = arith.constant 0 : index
    %c0_7 = arith.constant 0 : index
    %10 = vector.load %arg4[%c0_6, %c0_7] : memref<32x16xbf16, #tpu.memory_space<vmem>>, vector<32x16xbf16>
    %cst_8 = arith.constant dense<0.000000e+00> : vector<128x16xf32>
    %11 = tpu.matmul %9, %10, %cst_8 {dimension_numbers = #tpu.dot_dimension_numbers<[1], [0], [0], [1], [0, 0, 1, 1], [], []>} : vector<128x32xbf16>, vector<32x16xbf16>, vector<128x16xf32> -> vector<128x16xf32>
    %c0_9 = arith.constant 0 : index
    %c0_10 = arith.constant 0 : index
    %12 = vector.load %arg5[%c0_9, %c0_10] : memref<1x16xf32, #tpu.memory_space<vmem>>, vector<1x16xf32>
    %13 = vector.broadcast %12 : vector<1x16xf32> to vector<128x16xf32>
    %14 = arith.addf %11, %13 : vector<128x16xf32>
    %cst_11 = arith.constant 0.000000e+00 : f32
    %15 = vector.broadcast %cst_11 : f32 to vector<128x16xf32>
    %16 = arith.maximumf %14, %15 : vector<128x16xf32>
    %17 = arith.truncf %16 : vector<128x16xf32> to vector<128x16xbf16>
    %c0_12 = arith.constant 0 : index
    %c0_13 = arith.constant 0 : index
    %18 = vector.load %arg6[%c0_12, %c0_13] : memref<16x8xbf16, #tpu.memory_space<vmem>>, vector<16x8xbf16>
    %cst_14 = arith.constant dense<0.000000e+00> : vector<128x8xf32>
    %19 = tpu.matmul %17, %18, %cst_14 {dimension_numbers = #tpu.dot_dimension_numbers<[1], [0], [0], [1], [0, 0, 1, 1], [], []>} : vector<128x16xbf16>, vector<16x8xbf16>, vector<128x8xf32> -> vector<128x8xf32>
    %c0_15 = arith.constant 0 : index
    %c0_16 = arith.constant 0 : index
    %20 = vector.load %arg7[%c0_15, %c0_16] : memref<1x8xf32, #tpu.memory_space<vmem>>, vector<1x8xf32>
    %21 = vector.broadcast %20 : vector<1x8xf32> to vector<128x8xf32>
    %22 = arith.addf %19, %21 : vector<128x8xf32>
    %cst_17 = arith.constant 0.000000e+00 : f32
    %23 = vector.broadcast %cst_17 : f32 to vector<128x8xf32>
    %24 = arith.maximumf %22, %23 : vector<128x8xf32>
    %25 = arith.truncf %24 : vector<128x8xf32> to vector<128x8xbf16>
    %c0_18 = arith.constant 0 : index
    %c0_19 = arith.constant 0 : index
    %26 = vector.load %arg8[%c0_18, %c0_19] : memref<8x4xbf16, #tpu.memory_space<vmem>>, vector<8x4xbf16>
    %cst_20 = arith.constant dense<0.000000e+00> : vector<128x4xf32>
    %27 = tpu.matmul %25, %26, %cst_20 {dimension_numbers = #tpu.dot_dimension_numbers<[1], [0], [0], [1], [0, 0, 1, 1], [], []>} : vector<128x8xbf16>, vector<8x4xbf16>, vector<128x4xf32> -> vector<128x4xf32>
    %c0_21 = arith.constant 0 : index
    %c0_22 = arith.constant 0 : index
    %28 = vector.load %arg9[%c0_21, %c0_22] : memref<1x4xf32, #tpu.memory_space<vmem>>, vector<1x4xf32>
    %29 = vector.broadcast %28 : vector<1x4xf32> to vector<128x4xf32>
    %30 = arith.addf %27, %29 : vector<128x4xf32>
    %cst_23 = arith.constant 0.000000e+00 : f32
    %31 = vector.broadcast %cst_23 : f32 to vector<128x4xf32>
    %32 = arith.maximumf %30, %31 : vector<128x4xf32>
    %c0_24 = arith.constant 0 : index
    %c0_25 = arith.constant 0 : index
    %33 = vector.load %arg10[%c0_24, %c0_25] : memref<4x4xbf16, #tpu.memory_space<vmem>>, vector<4x4xbf16>
    %34 = arith.truncf %32 : vector<128x4xf32> to vector<128x4xbf16>
    %cst_26 = arith.constant dense<0.000000e+00> : vector<4x128xf32>
    %35 = tpu.matmul %33, %34, %cst_26 {dimension_numbers = #tpu.dot_dimension_numbers<[1], [1], [0], [0], [0, 0, 1, 0], [], []>} : vector<4x4xbf16>, vector<128x4xbf16>, vector<4x128xf32> -> vector<4x128xf32>
    %c0_27 = arith.constant 0 : index
    %c0_28 = arith.constant 0 : index
    %36 = vector.load %arg11[%c0_27, %c0_28] : memref<4x1xf32, #tpu.memory_space<vmem>>, vector<4x1xf32>
    %37 = vector.broadcast %36 : vector<4x1xf32> to vector<4x128xf32>
    %38 = arith.addf %35, %37 : vector<4x128xf32>
    %c0_29 = arith.constant 0 : index
    %c0_30 = arith.constant 0 : index
    %39 = vector.load %arg12[%c0_29, %c0_30] : memref<4x128xf32, #tpu.memory_space<vmem>>, vector<4x128xf32>
    tpu.vector_store %arg12[%c0_29, %c0_30], %38 {strides = array<i32>} : memref<4x128xf32, #tpu.memory_space<vmem>>, vector<4x128xf32>,
    return
  }
  func.func @transform_0(%arg0: i32) -> (i32, i32) {
    %c0_i32 = arith.constant 0 : i32
    %c0_i32_0 = arith.constant 0 : i32
    return %arg0, %c0_i32 : i32, i32
  }
  func.func @transform_1(%arg0: i32) -> (i32, i32) {
    %c0_i32 = arith.constant 0 : i32
    %c0_i32_0 = arith.constant 0 : i32
    %c0_i32_1 = arith.constant 0 : i32
    return %c0_i32, %c0_i32_0 : i32, i32
  }
  func.func @transform_2(%arg0: i32) -> (i32, i32) {
    %c0_i32 = arith.constant 0 : i32
    %c0_i32_0 = arith.constant 0 : i32
    %c0_i32_1 = arith.constant 0 : i32
    return %c0_i32, %c0_i32_0 : i32, i32
  }
  func.func @transform_3(%arg0: i32) -> (i32, i32) {
    %c0_i32 = arith.constant 0 : i32
    %c0_i32_0 = arith.constant 0 : i32
    %c0_i32_1 = arith.constant 0 : i32
    return %c0_i32, %c0_i32_0 : i32, i32
  }
  func.func @transform_4(%arg0: i32) -> (i32, i32) {
    %c0_i32 = arith.constant 0 : i32
    %c0_i32_0 = arith.constant 0 : i32
    %c0_i32_1 = arith.constant 0 : i32
    return %c0_i32, %c0_i32_0 : i32, i32
  }
  func.func @transform_5(%arg0: i32) -> (i32, i32) {
    %c0_i32 = arith.constant 0 : i32
    %c0_i32_0 = arith.constant 0 : i32
    %c0_i32_1 = arith.constant 0 : i32
    return %c0_i32, %c0_i32_0 : i32, i32
  }
  func.func @transform_6(%arg0: i32) -> (i32, i32) {
    %c0_i32 = arith.constant 0 : i32
    %c0_i32_0 = arith.constant 0 : i32
    %c0_i32_1 = arith.constant 0 : i32
    return %c0_i32, %c0_i32_0 : i32, i32
  }
  func.func @transform_7(%arg0: i32) -> (i32, i32) {
    %c0_i32 = arith.constant 0 : i32
    %c0_i32_0 = arith.constant 0 : i32
    %c0_i32_1 = arith.constant 0 : i32
    return %c0_i32, %c0_i32_0 : i32, i32
  }
  func.func @transform_8(%arg0: i32) -> (i32, i32) {
    %c0_i32 = arith.constant 0 : i32
    %c0_i32_0 = arith.constant 0 : i32
    %c0_i32_1 = arith.constant 0 : i32
    return %c0_i32, %c0_i32_0 : i32, i32
  }
  func.func @transform_9(%arg0: i32) -> (i32, i32) {
    %c0_i32 = arith.constant 0 : i32
    %c0_i32_0 = arith.constant 0 : i32
    %c0_i32_1 = arith.constant 0 : i32
    return %c0_i32, %c0_i32_0 : i32, i32
  }
  func.func @transform_10(%arg0: i32) -> (i32, i32) {
    %c0_i32 = arith.constant 0 : i32
    %c0_i32_0 = arith.constant 0 : i32
    %c0_i32_1 = arith.constant 0 : i32
    return %c0_i32, %c0_i32_0 : i32, i32
  }
  func.func @transform_11(%arg0: i32) -> (i32, i32) {
    %c0_i32 = arith.constant 0 : i32
    %c0_i32_0 = arith.constant 0 : i32
    return %c0_i32, %arg0 : i32, i32
  }
}

</mosaic_0001>

<bundles_post_ra>
// kernel: tpu_custom_call.1
= control target key start
LH: loop header
LB: loop body
LE: loop exit
PB: predicated region body
PF: predicated region fallthrough
CT: control target
= control target key end

     0   :  { %s1393_s0 = inlined_call_operand.vmem [shape: f32[256,16], index: 0, kind: input, shape index: {}]   ;;  %s1394_s1 = inlined_call_operand.vmem [shape: bf16[16,32], index: 1, kind: input, shape index: {}]   ;;  %s1395_s2 = inlined_call_operand.vmem [shape: f32[1,32], index: 2, kind: input, shape index: {}]   ;;  %s1396_s3 = inlined_call_operand.vmem [shape: bf16[32,16], index: 3, kind: input, shape index: {}]   ;;  %s1397_s4 = inlined_call_operand.vmem [shape: f32[1,16], index: 4, kind: input, shape index: {}]   ;;  %s1398_s5 = inlined_call_operand.vmem [shape: bf16[16,8], index: 5, kind: input, shape index: {}]   ;;  %s1399_s6 = inlined_call_operand.vmem [shape: f32[1,8], index: 6, kind: input, shape index: {}]   ;;  %s1400_s7 = inlined_call_operand.vmem [shape: bf16[8,4], index: 7, kind: input, shape index: {}]   ;;  %s1401_s8 = inlined_call_operand.vmem [shape: f32[1,4], index: 8, kind: input, shape index: {}]   ;;  %s1402_s9 = inlined_call_operand.vmem [shape: bf16[4,4], index: 9, kind: input, shape index: {}]   ;;  %s1403_s10 = inlined_call_operand.vmem [shape: f32[4,1], index: 10, kind: input, shape index: {}]   ;;  %s1404_s11 = inlined_call_operand.hbm [shape: f32[4,256], index: 11, kind: output, shape index: {}]  }
   0x1   :  { %1405 = sst [smem:[#allocation5_spill]] %s1393_s0 }
   0x2   :  { %1406 = sst [smem:[#allocation6_spill]] %s1394_s1 }
   0x3   :  { %16 = vsyncpa [#allocation3], 0 }
   0x4   :  { %18 = vsyncpa [#allocation3 + $0x1], 0  ;;  %s1214_s17 = smov 0   ;;  %s1216_s18 = smov 0  }
   0x5   :  { %s1218_s19 = smov 0   ;;  %s1220_s20 = smov 0  }
   0x6 LB: > { %s1235_s21 = sadd.s32 4294967295, %s1151_s20   ;;  %s980_s22 = sadd.s32 4294967294, %s1151_s20   ;;  %s1151_s20 = sphi %s1220_s20, %s1414_s20   ;;  %s1147_s19 = sphi %s1218_s19, %s1413_s19   ;;  %s1143_s18 = sphi %s1216_s18, %s1412_s18   ;;  %s1139_s17 = sphi %s1214_s17, %s1411_s17  }
   0x7   : > { %s1239_s23 = sadd.s32 1, %s1151_s20   ;;  %s267_s24 = sadd.s32 1, %s1147_s19 }
   0x8   : > { %s264_s25 = ssub.s32 %s1151_s20, %s1239_s23  ;;  %p277_p0 = scmp.ne.s32.totalorder %s1147_s19, %s1143_s18 }
   0x9   : > { %p265_p1 = scmp.eq.s32.totalorder %s264_s25, 0  ;;  %p278_p2 = scmp.eq.s32.totalorder %s1235_s21, 1 }
   0xa   : > { %p283_p3 = scmp.ne.s32.totalorder %s1143_s18, %s1139_s17  ;;  %p284_p4 = scmp.eq.s32.totalorder %s980_s22, 1 }
   0xb   : > { %s1250_s26 = scalar_select %p265_p1, %s1147_s19, %s267_s24  }
   0xc   : > { %p1252_p5 = por %p278_p2, %p277_p0  ;;  %p1256_p6 = por %p284_p4, %p283_p3 }
   0xd   : > { %p983_p7 = scmp.ge.s32.totalorder %s1151_s20, 1  ;;  %p341_p8 = scmp.lt.s32.totalorder %s1151_s20, 3 }
   0xf   : > { %p342_p9 = pnand %p983_p7, %p341_p8 }
  0x10   : > { %s1409_s1 = sld [smem:[#allocation6_spill]] (!%p342_p9)  ;;  %s985_s12 = sshll.u32 (!%p342_p9), %s1235_s21, 4 }
  0x11   : > { %345 = sbr.rel (%p342_p9) target bundleno = 910 (0x38e), region = 64  ;;  %p382_p10 = scmp.lt.s32.totalorder (!%p342_p9), %s985_s12, 31 }
  0x12   : > { %s1410_s0 = sld [smem:[#allocation5_spill]] (!%p342_p9)  ;;  %s378_s22 = sand.u32 (!%p342_p9), 1, %s1143_s18  }
  0x13   : > { %s1037_s24 = sshll.u32 (!%p342_p9), %s1235_s21, 2  ;;  %s984_s25 = sshll.u32 (!%p342_p9), %s378_s22, 2 }
  0x14   : > { %s906_s15 = scalar_lea.sflag (!%p342_p9), [#allocation3], %s378_s22 }
  0x16   : > { %v1040_v0 = vld [vmem:[%s1409_s1] sm:$0xff]  ;;  %s1416_s12 = smov (!%p382_p10, %s985_s12), 31  ;;  %vm424_vm0 = vcmask 130048   ;;  %v1042_v22 = vld [vmem:[%s1396_s3 + $0x8] sm:$0xff]  ;;  %vm542_vm1 = vcmask 261120   ;;  %vm779_vm2 = vcmask 1043456  }
  0x17   : > { %456 = vmatpush.bf16.msra.mxu0 %v1040_v0  ;;  %s986_s13 = sshll.u32 %s1416_s12, 3  ;;  %573 = vmatpush.bf16.msra.mxu1 %v1042_v22  ;;  %v1041_v23 = vld [vmem:[%s1396_s3] sm:$0xff]  ;;  %vm754_vm3 = vcmask 64512   ;;  %vm863_vm4 = vcmask 31744   ;;  %s916_s12 = scalar_lea.hbm %s1404_s11, %s1037_s24 }
  0x18   : > { %s1269_s16 = scalar_lea.vmem %s1410_s0, %s986_s13  ;;  %v1085_v28 = vld [vmem:[%s1395_s2] ss:$0 sm:$0xff]  ;;  %s380_s13 = scalar_lea.vmem [#allocation2], %s984_s25 }
  0x19   : > { %v388_v1 = vld [vmem:[%s1269_s16] sm:$0xff]  ;;  %v389_v2 = vld [vmem:[%s1269_s16 + $0x8] sm:$0xff]  ;;  %v390_v4 = vld [vmem:[%s1269_s16 + $0x10] sm:$0xff]  ;;  %s918_s14 = sshll.u32 %s380_s13, 4  ;;  %s920_s0 = sshll.u32 %s916_s12, 4  ;;  %s919_s14 = int_to_ptr.vmem [resolvable:$true] %s918_s14  ;;  %s921_s0 = int_to_ptr.hbm [resolvable:$true] %s920_s0 }
  0x1a   : > { %v404_v3 = vpack.c.bf16 %v389_v2, %v388_v1  ;;  %v391_v5 = vld [vmem:[%s1269_s16 + $0x18] sm:$0xff]  ;;  %v392_v7 = vld [vmem:[%s1269_s16 + $0x20] sm:$0xff]  ;;  %v393_v8 = vld [vmem:[%s1269_s16 + $0x28] sm:$0xff]  ;;  %s1109_s24 = scalar_lea.hbm %s1404_s11, 8 }
  0x1b   : > { %v405_v6 = vpack.c.bf16 %v391_v5, %v390_v4  ;;  %v406_v9 = vpack.c.bf16 %v393_v8, %v392_v7  ;;  %v394_v10 = vld [vmem:[%s1269_s16 + $0x30] sm:$0xff]  ;;  %v395_v11 = vld [vmem:[%s1269_s16 + $0x38] sm:$0xff]  ;;  %v396_v13 = vld [vmem:[%s1269_s16 + $0x40] sm:$0xff]  ;;  %574 = vmatpush.bf16.msra.mxu1 %v1041_v23 }
  0x1c   : > { %991 = vmatmul.msk.bf16.vlgmr.msra.gmra.mxu0 %vm424_vm0, %v404_v3  ;;  %v407_v12 = vpack.c.bf16 %v395_v11, %v394_v10  ;;  %v397_v14 = vld [vmem:[%s1269_s16 + $0x48] sm:$0xff]  ;;  %v398_v16 = vld [vmem:[%s1269_s16 + $0x50] sm:$0xff]  ;;  %v399_v17 = vld [vmem:[%s1269_s16 + $0x58] sm:$0xff] }
  0x1d   : > { %v408_v15 = vpack.c.bf16 %v397_v14, %v396_v13  ;;  %v409_v18 = vpack.c.bf16 %v399_v17, %v398_v16  ;;  %v400_v19 = vld [vmem:[%s1269_s16 + $0x60] sm:$0xff]  ;;  %v401_v20 = vld [vmem:[%s1269_s16 + $0x68] sm:$0xff]  ;;  %v402_v24 = vld [vmem:[%s1269_s16 + $0x70] sm:$0xff] }
  0x1e   : > { %v410_v21 = vpack.c.bf16 %v401_v20, %v400_v19  ;;  %v403_v25 = vld [vmem:[%s1269_s16 + $0x78] sm:$0xff]  ;;  %v1043_v14 = vld [vmem:[%s1398_s5] sm:$0xff]  ;;  %s1103_s16 = sshra.s32 %s921_s0, 4  ;;  %s1104_s16 = int_to_ptr.hbm [resolvable:$true] %s1103_s16 }
  0x1f   : > { %v411_v26 = vpack.c.bf16 %v403_v25, %v402_v24  ;;  %683 = vmatpush.bf16.msra.mxu2 %v1043_v14  ;;  %v1086_v22 = vld [vmem:[%s1397_s4] ss:$0 sm:$0xff]  ;;  %s1105_s1 = scalar_lea.hbm %s1104_s16, 4  ;;  %p1110_p0 = scmp.lt.s32.totalorder %s1104_s16, %s1404_s11 }
  0x20   : > { %p1106_p11 = scmp.ne.s32.totalorder %s1104_s16, %s1105_s1  ;;  %p1111_p1 = scmp.lt.s32.totalorder %s1109_s24, %s1105_s1 }
  0x22   : > { %p1107_p12 = pnand %p1106_p11, %p1252_p5  ;;  %p1112_p2 = por %p1111_p1, %p1110_p0 }
  0x24   : > { %p1108_p13 = pneg %p1107_p12 }
  0x26   : > { %p1113_p3 = pnand %p1112_p2, %p1108_p13 }
  0x2c   : > { %992 = vmatmul.msk.bf16.gmra.mxu0 %vm424_vm0, %v405_v6 }
  0x3c   : > { %993 = vmatmul.msk.bf16.gmra.mxu0 %vm424_vm0, %v406_v9 }
  0x4c   : > { %994 = vmatmul.msk.bf16.gmra.mxu0 %vm424_vm0, %v407_v12 }
  0x5c   : > { %995 = vmatmul.msk.bf16.gmra.mxu0 %vm424_vm0, %v408_v15 }
  0x6c   : > { %996 = vmatmul.msk.bf16.gmra.mxu0 %vm424_vm0, %v409_v18 }
  0x7c   : > { %997 = vmatmul.msk.bf16.gmra.mxu0 %vm424_vm0, %v410_v21 }
  0x8c   : > { %998 = vmatmul.msk.bf16.gmra.mxu0 %vm424_vm0, %v411_v26 }
  0x99   : > { %v458_v27 = vpop.f32.mrf.mxu0 }
  0x9a   : > { %v459_v29 = vadd.f32 %v1085_v28, %v458_v27 }
  0x9c   : > { %v498_v32 = vmax.f32 %v459_v29, 0.0 }
  0xa1   : > { %v460_v30 = vpop.f32.mrf.mxu0 }
  0xa2   : > { %v461_v31 = vadd.f32 %v1085_v28, %v460_v30 }
  0xa4   : > { %v499_v33 = vmax.f32 %v461_v31, 0.0 }
  0xa6   : > { %v514_v34 = vpack.c.bf16 %v499_v33, %v498_v32 }
  0xa8   : > { %1007 = vmatmul.msk.bf16.vlgmr.msra.gmra.mxu1 %vm542_vm1, %v514_v34 }
  0xa9   : > { %v463_v35 = vpop.f32.mrf.mxu0 }
  0xaa   : > { %v464_v36 = vadd.f32 %v1085_v28, %v463_v35 }
  0xac   : > { %v500_v39 = vmax.f32 %v464_v36, 0.0 }
  0xb1   : > { %v465_v37 = vpop.f32.mrf.mxu0 }
  0xb2   : > { %v466_v38 = vadd.f32 %v1085_v28, %v465_v37 }
  0xb4   : > { %v501_v40 = vmax.f32 %v466_v38, 0.0 }
  0xb6   : > { %v515_v41 = vpack.c.bf16 %v501_v40, %v500_v39 }
  0xb8   : > { %1008 = vmatmul.msk.bf16.gmra.mxu1 %vm542_vm1, %v515_v41 }
  0xb9   : > { %v468_v42 = vpop.f32.mrf.mxu0 }
  0xba   : > { %v469_v43 = vadd.f32 %v1085_v28, %v468_v42 }
  0xbc   : > { %v502_v46 = vmax.f32 %v469_v43, 0.0 }
  0xc1   : > { %v470_v44 = vpop.f32.mrf.mxu0 }
  0xc2   : > { %v471_v45 = vadd.f32 %v1085_v28, %v470_v44 }
  0xc4   : > { %v503_v47 = vmax.f32 %v471_v45, 0.0 }
  0xc6   : > { %v516_v48 = vpack.c.bf16 %v503_v47, %v502_v46 }
  0xc8   : > { %1009 = vmatmul.msk.bf16.gmra.mxu1 %vm542_vm1, %v516_v48 }
  0xc9   : > { %v473_v49 = vpop.f32.mrf.mxu0 }
  0xca   : > { %v474_v50 = vadd.f32 %v1085_v28, %v473_v49 }
  0xcc   : > { %v504_v53 = vmax.f32 %v474_v50, 0.0 }
  0xd1   : > { %v475_v51 = vpop.f32.mrf.mxu0 }
  0xd2   : > { %v476_v52 = vadd.f32 %v1085_v28, %v475_v51 }
  0xd4   : > { %v505_v54 = vmax.f32 %v476_v52, 0.0 }
  0xd6   : > { %v517_v55 = vpack.c.bf16 %v505_v54, %v504_v53 }
  0xd8   : > { %1010 = vmatmul.msk.bf16.gmra.mxu1 %vm542_vm1, %v517_v55 }
  0xd9   : > { %v478_v56 = vpop.f32.mrf.mxu0 }
  0xda   : > { %v479_v57 = vadd.f32 %v1085_v28, %v478_v56 }
  0xdc   : > { %v506_v60 = vmax.f32 %v479_v57, 0.0 }
  0xe1   : > { %v480_v58 = vpop.f32.mrf.mxu0 }
  0xe2   : > { %v481_v59 = vadd.f32 %v1085_v28, %v480_v58 }
  0xe4   : > { %v507_v61 = vmax.f32 %v481_v59, 0.0 }
  0xe6   : > { %v518_v62 = vpack.c.bf16 %v507_v61, %v506_v60 }
  0xe8   : > { %1011 = vmatmul.msk.bf16.gmra.mxu1 %vm542_vm1, %v518_v62 }
  0xe9   : > { %v483_v63 = vpop.f32.mrf.mxu0 }
  0xea   : > { %v484_v0 = vadd.f32 %v1085_v28, %v483_v63 }
  0xec   : > { %v508_v3 = vmax.f32 %v484_v0, 0.0 }
  0xf1   : > { %v485_v1 = vpop.f32.mrf.mxu0 }
  0xf2   : > { %v486_v2 = vadd.f32 %v1085_v28, %v485_v1 }
  0xf4   : > { %v509_v4 = vmax.f32 %v486_v2, 0.0 }
  0xf6   : > { %v519_v5 = vpack.c.bf16 %v509_v4, %v508_v3 }
  0xf8   : > { %1012 = vmatmul.msk.bf16.gmra.mxu1 %vm542_vm1, %v519_v5 }
  0xf9   : > { %v488_v6 = vpop.f32.mrf.mxu0 }
  0xfa   : > { %v489_v7 = vadd.f32 %v1085_v28, %v488_v6 }
  0xfc   : > { %v510_v10 = vmax.f32 %v489_v7, 0.0 }
 0x101   : > { %v490_v8 = vpop.f32.mrf.mxu0 }
 0x102   : > { %v491_v9 = vadd.f32 %v1085_v28, %v490_v8 }
 0x104   : > { %v511_v11 = vmax.f32 %v491_v9, 0.0 }
 0x106   : > { %v520_v12 = vpack.c.bf16 %v511_v11, %v510_v10 }
 0x108   : > { %1013 = vmatmul.msk.bf16.gmra.mxu1 %vm542_vm1, %v520_v12 }
 0x109   : > { %v493_v13 = vpop.f32.mrf.mxu0 }
 0x10a   : > { %v494_v15 = vadd.f32 %v1085_v28, %v493_v13  ;;  %v749_v13 = vld [vmem:[%s1400_s7] sm:$0xf] }
 0x10c   : > { %v512_v18 = vmax.f32 %v494_v15, 0.0  ;;  %v781_v15 = vsel %vm779_vm2, %v749_v13, 0 }
 0x10d   : > { %790 = vmatpush.bf16.msra.mxu3 %v781_v15 }
 0x111   : > { %v495_v16 = vpop.f32.mrf.mxu0 }
 0x112   : > { %v496_v17 = vadd.f32 %v1085_v28, %v495_v16 }
 0x114   : > { %v513_v19 = vmax.f32 %v496_v17, 0.0  ;;  %v1087_v17 = vld [vmem:[%s1399_s6] ss:$0 sm:$0xff] }
 0x116   : > { %v521_v20 = vpack.c.bf16 %v513_v19, %v512_v18 }
 0x118   : > { %1014 = vmatmul.msk.bf16.gmra.mxu1 %vm542_vm1, %v521_v20 }
 0x125   : > { %v576_v21 = vpop.f32.mrf.mxu1 }
 0x126   : > { %v577_v23 = vadd.f32 %v1086_v22, %v576_v21 }
 0x128   : > { %v616_v26 = vmax.f32 %v577_v23, 0.0 }
 0x12d   : > { %v578_v24 = vpop.f32.mrf.mxu1 }
 0x12e   : > { %v579_v25 = vadd.f32 %v1086_v22, %v578_v24 }
 0x130   : > { %v617_v27 = vmax.f32 %v579_v25, 0.0 }
 0x132   : > { %v632_v29 = vpack.c.bf16 %v617_v27, %v616_v26 }
 0x134   : > { %1019 = vmatmul.msk.bf16.vlgmr.msra.gmra.mxu2 %vm424_vm0, %v632_v29 }
 0x135   : > { %v581_v30 = vpop.f32.mrf.mxu1 }
 0x136   : > { %v582_v28 = vadd.f32 %v1086_v22, %v581_v30 }
 0x138   : > { %v618_v33 = vmax.f32 %v582_v28, 0.0 }
 0x13d   : > { %v583_v31 = vpop.f32.mrf.mxu1 }
 0x13e   : > { %v584_v32 = vadd.f32 %v1086_v22, %v583_v31 }
 0x140   : > { %v619_v34 = vmax.f32 %v584_v32, 0.0 }
 0x142   : > { %v633_v35 = vpack.c.bf16 %v619_v34, %v618_v33 }
 0x144   : > { %1020 = vmatmul.msk.bf16.gmra.mxu2 %vm424_vm0, %v633_v35 }
 0x145   : > { %v586_v36 = vpop.f32.mrf.mxu1 }
 0x146   : > { %v587_v37 = vadd.f32 %v1086_v22, %v586_v36 }
 0x148   : > { %v620_v40 = vmax.f32 %v587_v37, 0.0 }
 0x14d   : > { %v588_v38 = vpop.f32.mrf.mxu1 }
 0x14e   : > { %v589_v39 = vadd.f32 %v1086_v22, %v588_v38 }
 0x150   : > { %v621_v41 = vmax.f32 %v589_v39, 0.0 }
 0x152   : > { %v634_v42 = vpack.c.bf16 %v621_v41, %v620_v40 }
 0x154   : > { %1021 = vmatmul.msk.bf16.gmra.mxu2 %vm424_vm0, %v634_v42 }
 0x155   : > { %v591_v43 = vpop.f32.mrf.mxu1 }
 0x156   : > { %v592_v44 = vadd.f32 %v1086_v22, %v591_v43 }
 0x158   : > { %v622_v47 = vmax.f32 %v592_v44, 0.0 }
 0x15d   : > { %v593_v45 = vpop.f32.mrf.mxu1 }
 0x15e   : > { %v594_v46 = vadd.f32 %v1086_v22, %v593_v45 }
 0x160   : > { %v623_v48 = vmax.f32 %v594_v46, 0.0 }
 0x162   : > { %v635_v49 = vpack.c.bf16 %v623_v48, %v622_v47 }
 0x164   : > { %1022 = vmatmul.msk.bf16.gmra.mxu2 %vm424_vm0, %v635_v49 }
 0x165   : > { %v596_v50 = vpop.f32.mrf.mxu1 }
 0x166   : > { %v597_v51 = vadd.f32 %v1086_v22, %v596_v50 }
 0x168   : > { %v624_v54 = vmax.f32 %v597_v51, 0.0 }
 0x16d   : > { %v598_v52 = vpop.f32.mrf.mxu1 }
 0x16e   : > { %v599_v53 = vadd.f32 %v1086_v22, %v598_v52 }
 0x170   : > { %v625_v55 = vmax.f32 %v599_v53, 0.0 }
 0x172   : > { %v636_v56 = vpack.c.bf16 %v625_v55, %v624_v54 }
 0x174   : > { %1023 = vmatmul.msk.bf16.gmra.mxu2 %vm424_vm0, %v636_v56 }
 0x175   : > { %v601_v57 = vpop.f32.mrf.mxu1 }
 0x176   : > { %v602_v58 = vadd.f32 %v1086_v22, %v601_v57 }
 0x178   : > { %v626_v61 = vmax.f32 %v602_v58, 0.0 }
 0x17d   : > { %v603_v59 = vpop.f32.mrf.mxu1 }
 0x17e   : > { %v604_v60 = vadd.f32 %v1086_v22, %v603_v59 }
 0x180   : > { %v627_v62 = vmax.f32 %v604_v60, 0.0 }
 0x182   : > { %v637_v63 = vpack.c.bf16 %v627_v62, %v626_v61 }
 0x184   : > { %1024 = vmatmul.msk.bf16.gmra.mxu2 %vm424_vm0, %v637_v63 }
 0x185   : > { %v606_v0 = vpop.f32.mrf.mxu1 }
 0x186   : > { %v607_v1 = vadd.f32 %v1086_v22, %v606_v0 }
 0x188   : > { %v628_v4 = vmax.f32 %v607_v1, 0.0 }
 0x18d   : > { %v608_v2 = vpop.f32.mrf.mxu1 }
 0x18e   : > { %v609_v3 = vadd.f32 %v1086_v22, %v608_v2 }
 0x190   : > { %v629_v5 = vmax.f32 %v609_v3, 0.0 }
 0x192   : > { %v638_v6 = vpack.c.bf16 %v629_v5, %v628_v4 }
 0x194   : > { %1025 = vmatmul.msk.bf16.gmra.mxu2 %vm424_vm0, %v638_v6 }
 0x195   : > { %v611_v7 = vpop.f32.mrf.mxu1 }
 0x196   : > { %v612_v8 = vadd.f32 %v1086_v22, %v611_v7 }
 0x198   : > { %v630_v11 = vmax.f32 %v612_v8, 0.0 }
 0x19d   : > { %v613_v9 = vpop.f32.mrf.mxu1 }
 0x19e   : > { %v614_v10 = vadd.f32 %v1086_v22, %v613_v9 }
 0x1a0   : > { %v631_v12 = vmax.f32 %v614_v10, 0.0  ;;  %v1088_v10 = vld [vmem:[%s1401_s8] ss:$0 sm:$0xff] }
 0x1a2   : > { %v639_v14 = vpack.c.bf16 %v631_v12, %v630_v11 }
 0x1a4   : > { %1026 = vmatmul.msk.bf16.gmra.mxu2 %vm424_vm0, %v639_v14 }
 0x1b7   : > { %v685_v16 = vpop.f32.mrf.mxu2 }
 0x1b8   : > { %v686_v18 = vadd.f32 %v1087_v17, %v685_v16 }
 0x1ba   : > { %v725_v21 = vmax.f32 %v686_v18, 0.0 }
 0x1bf   : > { %v687_v19 = vpop.f32.mrf.mxu2 }
 0x1c0   : > { %v688_v20 = vadd.f32 %v1087_v17, %v687_v19 }
 0x1c2   : > { %v726_v22 = vmax.f32 %v688_v20, 0.0 }
 0x1c4   : > { %v741_v23 = vpack.c.bf16 %v726_v22, %v725_v21 }
 0x1c6   : > { %1027 = vmatmul.msk.bf16.vlgmr.msra.gmra.mxu3 %vm754_vm3, %v741_v23 }
 0x1c7   : > { %v690_v24 = vpop.f32.mrf.mxu2 }
 0x1c8   : > { %v691_v25 = vadd.f32 %v1087_v17, %v690_v24 }
 0x1ca   : > { %v727_v29 = vmax.f32 %v691_v25, 0.0 }
 0x1cf   : > { %v692_v26 = vpop.f32.mrf.mxu2 }
 0x1d0   : > { %v693_v27 = vadd.f32 %v1087_v17, %v692_v26 }
 0x1d2   : > { %v728_v30 = vmax.f32 %v693_v27, 0.0 }
 0x1d4   : > { %v742_v28 = vpack.c.bf16 %v728_v30, %v727_v29 }
 0x1d6   : > { %1028 = vmatmul.msk.bf16.gmra.mxu3 %vm754_vm3, %v742_v28 }
 0x1d7   : > { %v695_v31 = vpop.f32.mrf.mxu2 }
 0x1d8   : > { %v696_v32 = vadd.f32 %v1087_v17, %v695_v31 }
 0x1da   : > { %v729_v35 = vmax.f32 %v696_v32, 0.0 }
 0x1df   : > { %v697_v33 = vpop.f32.mrf.mxu2 }
 0x1e0   : > { %v698_v34 = vadd.f32 %v1087_v17, %v697_v33 }
 0x1e2   : > { %v730_v36 = vmax.f32 %v698_v34, 0.0 }
 0x1e4   : > { %v743_v37 = vpack.c.bf16 %v730_v36, %v729_v35 }
 0x1e6   : > { %1029 = vmatmul.msk.bf16.gmra.mxu3 %vm754_vm3, %v743_v37 }
 0x1e7   : > { %v700_v38 = vpop.f32.mrf.mxu2 }
 0x1e8   : > { %v701_v39 = vadd.f32 %v1087_v17, %v700_v38 }
 0x1ea   : > { %v731_v42 = vmax.f32 %v701_v39, 0.0 }
 0x1ef   : > { %v702_v40 = vpop.f32.mrf.mxu2 }
 0x1f0   : > { %v703_v41 = vadd.f32 %v1087_v17, %v702_v40 }
 0x1f2   : > { %v732_v43 = vmax.f32 %v703_v41, 0.0 }
 0x1f4   : > { %v744_v44 = vpack.c.bf16 %v732_v43, %v731_v42 }
 0x1f6   : > { %1030 = vmatmul.msk.bf16.gmra.mxu3 %vm754_vm3, %v744_v44 }
 0x1f7   : > { %v705_v45 = vpop.f32.mrf.mxu2 }
 0x1f8   : > { %v706_v46 = vadd.f32 %v1087_v17, %v705_v45 }
 0x1fa   : > { %v733_v49 = vmax.f32 %v706_v46, 0.0 }
 0x1ff   : > { %v707_v47 = vpop.f32.mrf.mxu2 }
 0x200   : > { %v708_v48 = vadd.f32 %v1087_v17, %v707_v47 }
 0x202   : > { %v734_v50 = vmax.f32 %v708_v48, 0.0 }
 0x204   : > { %v745_v51 = vpack.c.bf16 %v734_v50, %v733_v49 }
 0x206   : > { %1031 = vmatmul.msk.bf16.gmra.mxu3 %vm754_vm3, %v745_v51 }
 0x207   : > { %v710_v52 = vpop.f32.mrf.mxu2 }
 0x208   : > { %v711_v53 = vadd.f32 %v1087_v17, %v710_v52 }
 0x20a   : > { %v735_v56 = vmax.f32 %v711_v53, 0.0 }
 0x20f   : > { %v712_v54 = vpop.f32.mrf.mxu2 }
 0x210   : > { %v713_v55 = vadd.f32 %v1087_v17, %v712_v54 }
 0x212   : > { %v736_v57 = vmax.f32 %v713_v55, 0.0 }
 0x214   : > { %v746_v58 = vpack.c.bf16 %v736_v57, %v735_v56 }
 0x216   : > { %1032 = vmatmul.msk.bf16.gmra.mxu3 %vm754_vm3, %v746_v58 }
 0x217   : > { %v715_v59 = vpop.f32.mrf.mxu2 }
 0x218   : > { %v716_v60 = vadd.f32 %v1087_v17, %v715_v59 }
 0x21a   : > { %v737_v63 = vmax.f32 %v716_v60, 0.0 }
 0x21f   : > { %v717_v61 = vpop.f32.mrf.mxu2 }
 0x220   : > { %v718_v62 = vadd.f32 %v1087_v17, %v717_v61 }
 0x222   : > { %v738_v0 = vmax.f32 %v718_v62, 0.0 }
 0x224   : > { %v747_v1 = vpack.c.bf16 %v738_v0, %v737_v63 }
 0x226   : > { %1033 = vmatmul.msk.bf16.gmra.mxu3 %vm754_vm3, %v747_v1 }
 0x227   : > { %v720_v2 = vpop.f32.mrf.mxu2 }
 0x228   : > { %v721_v3 = vadd.f32 %v1087_v17, %v720_v2 }
 0x22a   : > { %v739_v6 = vmax.f32 %v721_v3, 0.0 }
 0x22f   : > { %v722_v4 = vpop.f32.mrf.mxu2 }
 0x230   : > { %v723_v5 = vadd.f32 %v1087_v17, %v722_v4 }
 0x232   : > { %v740_v7 = vmax.f32 %v723_v5, 0.0 }
 0x234   : > { %v748_v8 = vpack.c.bf16 %v740_v7, %v739_v6  ;;  %v857_v7 = vld [vmem:[%s1403_s10] sm:$0xf] }
 0x236   : > { %1034 = vmatmul.msk.bf16.gmra.mxu3 %vm754_vm3, %v748_v8  ;;  %v1153_v8 = vmov 0  }
 0x237   : > { %1084 = vset.pattern.permute.xlu0 %v1153_v8 }
 0x238   : > { %860 = vperm.xlu0 %1084, %v857_v7  }
 0x249   : > { %v792_v9 = vpop.f32.mrf.mxu3 }
 0x24a   : > { %v793_v11 = vadd.f32 %v1088_v10, %v792_v9 }
 0x24c   : > { %v832_v14 = vmax.f32 %v793_v11, 0.0 }
 0x251   : > { %v794_v12 = vpop.f32.mrf.mxu3 }
 0x252   : > { %v795_v13 = vadd.f32 %v1088_v10, %v794_v12  ;;  %v848_v12 = vld [vmem:[%s1402_s9] sm:$0x3] }
 0x254   : > { %v833_v15 = vmax.f32 %v795_v13, 0.0 }
 0x256   : > { %v1343_v16 = vpack.c.bf16 %v833_v15, %v832_v14 }
 0x258   : > { %v868_v11 = vsel %vm863_vm4, %v1343_v16, 0 }
 0x259   : > { %v797_v18 = vpop.f32.mrf.mxu3 }
 0x25a   : > { %v798_v19 = vadd.f32 %v1088_v10, %v797_v18 }
 0x25c   : > { %v834_v21 = vmax.f32 %v798_v19, 0.0 }
 0x261   : > { %v799_v17 = vpop.f32.mrf.mxu3 }
 0x262   : > { %v800_v20 = vadd.f32 %v1088_v10, %v799_v17 }
 0x264   : > { %v835_v22 = vmax.f32 %v800_v20, 0.0 }
 0x266   : > { %v850_v23 = vpack.c.bf16 %v835_v22, %v834_v21 }
 0x269   : > { %v802_v24 = vpop.f32.mrf.mxu3 }
 0x26a   : > { %v803_v25 = vadd.f32 %v1088_v10, %v802_v24 }
 0x26c   : > { %v836_v29 = vmax.f32 %v803_v25, 0.0 }
 0x271   : > { %v804_v26 = vpop.f32.mrf.mxu3 }
 0x272   : > { %v805_v27 = vadd.f32 %v1088_v10, %v804_v26 }
 0x274   : > { %v837_v30 = vmax.f32 %v805_v27, 0.0 }
 0x276   : > { %v851_v28 = vpack.c.bf16 %v837_v30, %v836_v29 }
 0x278   : > { %v874_v9 = vsel %vm863_vm4, %v851_v28, 0 }
 0x279   : > { %v807_v31 = vpop.f32.mrf.mxu3 }
 0x27a   : > { %v808_v32 = vadd.f32 %v1088_v10, %v807_v31 }
 0x27c   : > { %v838_v35 = vmax.f32 %v808_v32, 0.0 }
 0x281   : > { %v809_v33 = vpop.f32.mrf.mxu3 }
 0x282   : > { %v810_v34 = vadd.f32 %v1088_v10, %v809_v33 }
 0x284   : > { %v839_v36 = vmax.f32 %v810_v34, 0.0 }
 0x286   : > { %v852_v37 = vpack.c.bf16 %v839_v36, %v838_v35 }
 0x288   : > { %v877_v6 = vsel %vm863_vm4, %v852_v37, 0 }
 0x289   : > { %v812_v38 = vpop.f32.mrf.mxu3 }
 0x28a   : > { %v813_v39 = vadd.f32 %v1088_v10, %v812_v38 }
 0x28c   : > { %v840_v42 = vmax.f32 %v813_v39, 0.0 }
 0x291   : > { %v814_v40 = vpop.f32.mrf.mxu3 }
 0x292   : > { %v815_v41 = vadd.f32 %v1088_v10, %v814_v40 }
 0x294   : > { %v841_v43 = vmax.f32 %v815_v41, 0.0 }
 0x296   : > { %v853_v44 = vpack.c.bf16 %v841_v43, %v840_v42 }
 0x298   : > { %v880_v5 = vsel %vm863_vm4, %v853_v44, 0 }
 0x299   : > { %v817_v45 = vpop.f32.mrf.mxu3 }
 0x29a   : > { %v818_v63 = vadd.f32 %v1088_v10, %v817_v45 }
 0x29c   : > { %v842_v2 = vmax.f32 %v818_v63, 0.0 }
 0x2a1   : > { %v819_v46 = vpop.f32.mrf.mxu3 }
 0x2a2   : > { %v820_v61 = vadd.f32 %v1088_v10, %v819_v46 }
 0x2a4   : > { %v843_v0 = vmax.f32 %v820_v61, 0.0 }
 0x2a6   : > { %v854_v3 = vpack.c.bf16 %v843_v0, %v842_v2 }
 0x2a8   : > { %v883_v4 = vsel %vm863_vm4, %v854_v3, 0 }
 0x2a9   : > { %v822_v47 = vpop.f32.mrf.mxu3 }
 0x2aa   : > { %v823_v56 = vadd.f32 %v1088_v10, %v822_v47  ;;  %v861_v13 = vpop.permute.xlu0 %860 }
 0x2ac   : > { %v844_v60 = vmax.f32 %v823_v56, 0.0 }
 0x2b1   : > { %v824_v48 = vpop.f32.mrf.mxu3 }
 0x2b2   : > { %v825_v53 = vadd.f32 %v1088_v10, %v824_v48 }
 0x2b4   : > { %v845_v58 = vmax.f32 %v825_v53, 0.0 }
 0x2b6   : > { %v855_v62 = vpack.c.bf16 %v845_v58, %v844_v60 }
 0x2b8   : > { %v886_v1 = vsel %vm863_vm4, %v855_v62, 0 }
 0x2b9   : > { %v827_v49 = vpop.f32.mrf.mxu3 }
 0x2ba   : > { %v828_v50 = vadd.f32 %v1088_v10, %v827_v49 }
 0x2bc   : > { %v846_v54 = vmax.f32 %v828_v50, 0.0 }
 0x2c1   : > { %v829_v51 = vpop.f32.mrf.mxu3 }
 0x2c2   : > { %v830_v52 = vadd.f32 %v1088_v10, %v829_v51  ;;  %v871_v10 = vsel %vm863_vm4, %v850_v23, 0 }
 0x2c4   : > { %v847_v55 = vmax.f32 %v830_v52, 0.0 }
 0x2c6   : > { %v856_v57 = vpack.c.bf16 %v847_v55, %v846_v54 }
 0x2c8   : > { %v889_v59 = vsel %vm863_vm4, %v856_v57, 0 }
 0x2c9   : > { %891 = vmatpush.bf16.xpose.msrb.mxu0 %v889_v59 }
 0x2d1   : > { %892 = vmatpush.bf16.xpose.msrb.mxu0 %v886_v1 }
 0x2d9   : > { %893 = vmatpush.bf16.xpose.msrb.mxu0 %v883_v4 }
 0x2e1   : > { %894 = vmatpush.bf16.xpose.msrb.mxu0 %v880_v5 }
 0x2e9   : > { %895 = vmatpush.bf16.xpose.msrb.mxu0 %v877_v6 }
 0x2f1   : > { %896 = vmatpush.bf16.xpose.msrb.mxu0 %v874_v9 }
 0x2f9   : > { %897 = vmatpush.bf16.xpose.msrb.mxu0 %v871_v10 }
 0x301   : > { %898 = vmatpush.bf16.xpose.msrb.mxu0 %v868_v11 }
 0x308   : > { %1035 = vmatmul.msk.bf16.vlgmr.msrb.gmra.mxu0 %vm863_vm4, %v848_v12 }
 0x385   : > { %v900_v14 = vpop.f32.mrf.mxu0 }
 0x386   : > { %v901_v15 = vadd.f32 %v900_v14, %v861_v13 }
 0x388   : > { %904 = vst [vmem:[%s380_s13] sm:$0xf] %v901_v15 }
 0x389   : > { %1116 = shalt.err (!%p1113_p3)
}
 0x38a   : > { %1044 = dma.vmem_to_hbm [thread:$0]  (%p1252_p5), %s919_s14, 64, %s921_s0, %s906_s15  }
 0x38d   : > { %v902_v16 = vpop.f32.mrf.mxu0 }
 0x38e PF: > { %p1050_p4 = scmp.ge.s32.totalorder %s1151_s20, 2  ;;  %s932_s22 = sand.u32 1, %s1139_s17  }
 0x38f   : > { %s933_s12 = scalar_lea.sflag [#allocation3], %s932_s22 }
 0x390   : > { %p1047_p7 = pnand %p1050_p4, %p1256_p6 }
 0x392   : > { %p1048_p8 = pneg %p1047_p7 }
 0x394   : > { %1134 = dma.done.wait (%p1048_p8), %s933_s12, 64  }
 0x395   : > { %1136 = vsyncadd (%p1048_p8), %s933_s12, 4294967232  ;;  %p21_p9 = scmp.ge.s32.totalorder %s1239_s23, 4   ;;  %s1411_s17 = smov %s1143_s18 }
 0x396   : > { %s1412_s18 = smov %s1147_s19  ;;  %s1413_s19 = smov %s1250_s26 }
 0x397   : > { %s1414_s20 = smov %s1239_s23  ;;  %23 = sbr.rel (!%p21_p9) target bundleno = 6 (0x6), region = 99 }
 0x39c   :  { %939 = vsyncpa [#allocation3], 1 }
 0x39d   :  { %941 = vsyncpa [#allocation3 + $0x1], 1 }

</bundles_post_ra>
